<compile_context>
chip_gen: v6e
topology: v6e:2x2x1
jax: 0.10.0
libtpu: 0.0.40
codegen_flags: <defaults>
</compile_context>

<pallas_src>
import jax
import jax.numpy as jnp
import numpy as np
from jax.experimental import pallas as pl
from jax.experimental.pallas import tpu as pltpu

LANE = 128
SUBLANE = 8
NCORES = 2  # leading "parallel" grid axis: both TCs on v7x, serial (harmless) on v5e/v6e


def _round_up(a, m):
    return (a + m - 1) // m * m


def _round_down(a, m):
    return a // m * m


def geometry_gaps_kernel(x_ref, lab_ref, proto_ref, invc_ref, num_ref, den_ref):
    step = pl.program_id(1)

    @pl.when(step == 0)
    def _():
        num_ref[...] = jnp.zeros_like(num_ref)
        den_ref[...] = jnp.zeros_like(den_ref)

    x = x_ref[...].astype(jnp.float32)        # [TB, Dp]  (bf16 stream upcast in-register)
    lab = lab_ref[...]                        # [TB, 1]   int32 (padded rows = Cp sentinel)
    proto = proto_ref[...]                    # [Cp, Dp]  f32, resident
    invc = invc_ref[...]                      # [1, Cp]   f32, resident (0 for absent class)

    tb = x.shape[0]
    cp = proto.shape[0]

    # One-hot over classes; padded rows (label == Cp) give an all-zero row.
    cls_iota = jax.lax.broadcasted_iota(jnp.int32, (tb, cp), 1)
    one_hot = (lab == cls_iota).astype(jnp.float32)                     # [TB, Cp]

    # Gather each sample's prototype on the MXU (exact: one_hot rows are 0/1).
    p = jnp.dot(one_hot, proto, preferred_element_type=jnp.float32)     # [TB, Dp]

    # Per-sample 1/n_i (0 for padded rows / absent classes).
    inv_n = jnp.sum(one_hot * invc, axis=1, keepdims=True)              # [TB, 1]

    diff = p - x
    d = jnp.sqrt(jnp.sum(diff * diff, axis=1, keepdims=True))           # [TB, 1]

    num_ref[...] += jnp.sum(d * inv_n, keepdims=True).reshape(1, 1, 1)
    den_ref[...] += jnp.sum(inv_n, keepdims=True).reshape(1, 1, 1)


def geometry_gaps(image_features, labels, eeg_prototype):
    """image_features [B, D], labels [B] int, eeg_prototype [C, D] -> scalar f32."""
    B, D = image_features.shape
    C = eeg_prototype.shape[0]

    # Keep bf16 in HBM (the kernel is bound by the HBM read of x); upcast in-kernel.
    if image_features.dtype == jnp.bfloat16:
        x = image_features
    else:
        x = image_features.astype(jnp.float32)
    proto = eeg_prototype.astype(jnp.float32)
    labels = labels.astype(jnp.int32)

    # Per-class inverse counts (vectorized; no scatter-add, no B x B work).
    counts = jnp.bincount(labels, length=C).astype(jnp.float32)
    inv_counts = jnp.where(counts > 0, 1.0 / counts, 0.0)               # [C]

    # Lane-dense padding of the feature and class axes (zeros are inert).
    Dp = _round_up(D, LANE)
    Cp = _round_up(C, LANE)
    if Dp != D:
        x = jnp.pad(x, ((0, 0), (0, Dp - D)))
        proto = jnp.pad(proto, ((0, 0), (0, Dp - D)))
    if Cp != C:
        proto = jnp.pad(proto, ((0, Cp - C), (0, 0)))
    invc = jnp.pad(inv_counts.reshape(1, C), ((0, 0), (0, Cp - C)))

    # Per-generation VMEM budget.
    try:
        vmem_cap = int(pltpu.get_tpu_info().vmem_capacity_bytes)
    except Exception:
        vmem_cap = 64 * 1024 * 1024                                     # conservative (v7x)
    vmem_limit = int(min(96 * 1024 * 1024, (vmem_cap * 3) // 4))        # ~96MiB v5e/v6e, ~48MiB v7x

    # Tile rows: grow toward a ~4 MiB x tile; cap by the VMEM budget (which must
    # cover 2x the x tile, the resident proto/invc, and the [TB,Cp]/[TB,Dp]
    # compiler temporaries) and by each core's share of B.
    x_bytes = x.dtype.itemsize
    target_tile_bytes = 4 * 1024 * 1024
    TB = max(SUBLANE, _round_down(target_tile_bytes // (Dp * x_bytes), SUBLANE))

    per_row_bytes = 2 * Dp * x_bytes + 4 * (Cp + 2 * Dp)   # x (dbl-buf) + one_hot + p + diff
    resident_bytes = 2 * 4 * (Cp * Dp + Cp)                # proto + invc (double-buffered)
    vmem_budget = (vmem_limit * 6) // 10 - resident_bytes
    TB_vmem = max(SUBLANE, _round_down(max(vmem_budget, 0) // per_row_bytes, SUBLANE))

    per_core_cap = _round_up(-(-B // NCORES), SUBLANE)
    TB = max(SUBLANE, min(TB, TB_vmem, per_core_cap))

    Bp = _round_up(B, NCORES * TB)
    steps = Bp // (NCORES * TB)

    pad_b = Bp - B
    if pad_b:
        x = jnp.pad(x, ((0, pad_b), (0, 0)))
        # Sentinel label Cp: matches no class -> zero one-hot row, zero 1/n.
        labels = jnp.pad(labels, (0, pad_b), constant_values=Cp)
    lab2d = labels.reshape(Bp, 1)

    num_out, den_out = pl.pallas_call(
        geometry_gaps_kernel,
        out_shape=(
            jax.ShapeDtypeStruct((NCORES, 1, 1), jnp.float32),
            jax.ShapeDtypeStruct((NCORES, 1, 1), jnp.float32),
        ),
        grid_spec=pltpu.PrefetchScalarGridSpec(
            num_scalar_prefetch=0,
            grid=(NCORES, steps),
            in_specs=[
                pl.BlockSpec((TB, Dp), lambda c, i: (c * steps + i, 0)),   # x tile
                pl.BlockSpec((TB, 1), lambda c, i: (c * steps + i, 0)),    # labels tile
                pl.BlockSpec((Cp, Dp), lambda c, i: (0, 0)),               # prototypes (resident)
                pl.BlockSpec((1, Cp), lambda c, i: (0, 0)),                # 1/count (resident)
            ],
            out_specs=(
                pl.BlockSpec((1, 1, 1), lambda c, i: (c, 0, 0)),           # per-core numerator
                pl.BlockSpec((1, 1, 1), lambda c, i: (c, 0, 0)),           # per-core denominator
            ),
        ),
        compiler_params=pltpu.CompilerParams(
            dimension_semantics=("parallel", "arbitrary"),
            vmem_limit_bytes=vmem_limit,
        ),
    )(x, lab2d, proto, invc)

    return jnp.sum(num_out) / jnp.sum(den_out)


def _reference_numpy(x, labels, proto):
    """Direct port of the PyTorch forward (with numpy.unique)."""
    x = np.asarray(x, dtype=np.float64)
    labels = np.asarray(labels)
    proto = np.asarray(proto, dtype=np.float64)
    uniq = np.unique(labels)
    mask = (uniq[:, None] == labels[None, :]).astype(np.float64)
    proto_cls = proto[uniq]
    dis = np.sqrt(((proto_cls[:, None, :] - x[None, :, :]) ** 2).sum(-1))
    cls_dis = dis * mask
    cls_gaps = cls_dis.sum(1) / mask.sum(1)
    return cls_gaps.mean()


if __name__ == "__main__":
    key = jax.random.PRNGKey(0)
    k1, k2, k3 = jax.random.split(key, 3)

    B, D, C = 8, 32, 4
    image_features = jax.random.normal(k1, (B, D), dtype=jnp.float32)
    labels = jax.random.randint(k2, (B,), 0, C, dtype=jnp.int32)
    eeg_prototype = jax.random.normal(k3, (C, D), dtype=jnp.float32)

    loss = geometry_gaps(image_features, labels, eeg_prototype)
    loss = jax.block_until_ready(loss)

    ref = _reference_numpy(image_features, labels, eeg_prototype)
    assert np.allclose(np.asarray(loss), ref, rtol=1e-4, atol=1e-5), (loss, ref)

    print("KERNEL_OK")
</pallas_src>

<mosaic_0001>
module attributes {stable_mosaic.version = 11 : i64} {
  func.func @geometry_gaps_kernel(%arg0: i32, %arg1: i32, %arg2: memref<8x128xf32, #tpu.memory_space<vmem>>, %arg3: memref<8x1xi32, #tpu.memory_space<vmem>>, %arg4: memref<128x128xf32, #tpu.memory_space<vmem>>, %arg5: memref<1x128xf32, #tpu.memory_space<vmem>>, %arg6: memref<1x1x1xf32, #tpu.memory_space<vmem>>, %arg7: memref<1x1x1xf32, #tpu.memory_space<vmem>>) attributes {dimension_semantics = [#tpu.dimension_semantics<parallel>, #tpu.dimension_semantics<arbitrary>], iteration_bounds = array<i64: 2, 1>, scalar_prefetch = 0 : i64, scratch_operands = 0 : i64, tpu.core_type = #tpu.core_type<tc>, window_params = [{transform_indices = @transform_0, window_bounds = array<i64: 8, 128>}, {transform_indices = @transform_1, window_bounds = array<i64: 8, 1>}, {pipeline_mode = #tpu.pipeline_mode<synchronous>, transform_indices = @transform_2, window_bounds = array<i64: 128, 128>}, {pipeline_mode = #tpu.pipeline_mode<synchronous>, transform_indices = @transform_3, window_bounds = array<i64: 1, 128>}, {transform_indices = @transform_4, window_bounds = array<i64: 1, 1, 1>}, {transform_indices = @transform_5, window_bounds = array<i64: 1, 1, 1>}]} {
    %c0_i32 = arith.constant 0 : i32
    %0 = arith.cmpi eq, %arg1, %c0_i32 : i32
    %1 = arith.extui %0 : i1 to i32
    %c0_i32_0 = arith.constant 0 : i32
    %2 = arith.cmpi ne, %1, %c0_i32_0 : i32
    scf.if %2 {
      %cst_24 = arith.constant 0.000000e+00 : f32
      %41 = vector.broadcast %cst_24 : f32 to vector<1x1x1xf32>
      %c0_25 = arith.constant 0 : index
      %c0_26 = arith.constant 0 : index
      %c0_27 = arith.constant 0 : index
      %42 = vector.load %arg6[%c0_25, %c0_26, %c0_27] : memref<1x1x1xf32, #tpu.memory_space<vmem>>, vector<1x1x1xf32>
      tpu.vector_store %arg6[%c0_25, %c0_26, %c0_27], %41 {strides = array<i32>} : memref<1x1x1xf32, #tpu.memory_space<vmem>>, vector<1x1x1xf32>,
      %cst_28 = arith.constant 0.000000e+00 : f32
      %43 = vector.broadcast %cst_28 : f32 to vector<1x1x1xf32>
      %c0_29 = arith.constant 0 : index
      %c0_30 = arith.constant 0 : index
      %c0_31 = arith.constant 0 : index
      %44 = vector.load %arg7[%c0_29, %c0_30, %c0_31] : memref<1x1x1xf32, #tpu.memory_space<vmem>>, vector<1x1x1xf32>
      tpu.vector_store %arg7[%c0_29, %c0_30, %c0_31], %43 {strides = array<i32>} : memref<1x1x1xf32, #tpu.memory_space<vmem>>, vector<1x1x1xf32>,
    } else {
    }
    %c0 = arith.constant 0 : index
    %c0_1 = arith.constant 0 : index
    %3 = vector.load %arg2[%c0, %c0_1] : memref<8x128xf32, #tpu.memory_space<vmem>>, vector<8x128xf32>
    %c0_2 = arith.constant 0 : index
    %c0_3 = arith.constant 0 : index
    %4 = vector.load %arg3[%c0_2, %c0_3] : memref<8x1xi32, #tpu.memory_space<vmem>>, vector<8x1xi32>
    %c0_4 = arith.constant 0 : index
    %c0_5 = arith.constant 0 : index
    %5 = vector.load %arg4[%c0_4, %c0_5] : memref<128x128xf32, #tpu.memory_space<vmem>>, vector<128x128xf32>
    %c0_6 = arith.constant 0 : index
    %c0_7 = arith.constant 0 : index
    %6 = vector.load %arg5[%c0_6, %c0_7] : memref<1x128xf32, #tpu.memory_space<vmem>>, vector<1x128xf32>
    %7 = tpu.iota {dimensions = array<i32: 1>} : vector<8x128xi32>
    %8 = vector.broadcast %4 : vector<8x1xi32> to vector<8x128xi32>
    %9 = arith.cmpi eq, %8, %7 : vector<8x128xi32>
    %10 = arith.extui %9 : vector<8x128xi1> to vector<8x128xi32>
    %11 = arith.sitofp %10 : vector<8x128xi32> to vector<8x128xf32>
    %cst = arith.constant dense<0.000000e+00> : vector<8x128xf32>
    %12 = tpu.matmul %11, %5, %cst {dimension_numbers = #tpu.dot_dimension_numbers<[1], [0], [0], [1], [0, 0, 1, 1], [], []>} : vector<8x128xf32>, vector<128x128xf32>, vector<8x128xf32> -> vector<8x128xf32>
    %13 = vector.broadcast %6 : vector<1x128xf32> to vector<8x128xf32>
    %14 = arith.mulf %11, %13 : vector<8x128xf32>
    %cst_8 = arith.constant dense<0.000000e+00> : vector<8xf32>
    %15 = vector.multi_reduction <add>, %14, %cst_8 [1] : vector<8x128xf32> to vector<8xf32>
    %16 = vector.shape_cast %15 : vector<8xf32> to vector<8x1xf32>
    %17 = arith.subf %12, %3 : vector<8x128xf32>
    %18 = arith.mulf %17, %17 : vector<8x128xf32>
    %cst_9 = arith.constant dense<0.000000e+00> : vector<8xf32>
    %19 = vector.multi_reduction <add>, %18, %cst_9 [1] : vector<8x128xf32> to vector<8xf32>
    %20 = vector.shape_cast %19 : vector<8xf32> to vector<8x1xf32>
    %21 = math.sqrt %20 : vector<8x1xf32>
    %c0_10 = arith.constant 0 : index
    %c0_11 = arith.constant 0 : index
    %c0_12 = arith.constant 0 : index
    %22 = vector.load %arg6[%c0_10, %c0_11, %c0_12] : memref<1x1x1xf32, #tpu.memory_space<vmem>>, vector<1x1x1xf32>
    %23 = arith.mulf %21, %16 : vector<8x1xf32>
    %24 = vector.shape_cast %23 : vector<8x1xf32> to vector<1x8x1xf32>
    %cst_13 = arith.constant dense<0.000000e+00> : vector<1xf32>
    %25 = vector.multi_reduction <add>, %24, %cst_13 [1, 2] : vector<1x8x1xf32> to vector<1xf32>
    %26 = vector.shape_cast %25 : vector<1xf32> to vector<1x1x1xf32>
    %27 = vector.extract %26[0, 0, 0] : f32 from vector<1x1x1xf32>
    %28 = vector.broadcast %27 : f32 to vector<1x1xf32>
    %29 = vector.shape_cast %28 : vector<1x1xf32> to vector<1x1x1xf32>
    %30 = arith.addf %22, %29 : vector<1x1x1xf32>
    %c0_14 = arith.constant 0 : index
    %c0_15 = arith.constant 0 : index
    %c0_16 = arith.constant 0 : index
    %31 = vector.load %arg6[%c0_14, %c0_15, %c0_16] : memref<1x1x1xf32, #tpu.memory_space<vmem>>, vector<1x1x1xf32>
    tpu.vector_store %arg6[%c0_14, %c0_15, %c0_16], %30 {strides = array<i32>} : memref<1x1x1xf32, #tpu.memory_space<vmem>>, vector<1x1x1xf32>,
    %c0_17 = arith.constant 0 : index
    %c0_18 = arith.constant 0 : index
    %c0_19 = arith.constant 0 : index
    %32 = vector.load %arg7[%c0_17, %c0_18, %c0_19] : memref<1x1x1xf32, #tpu.memory_space<vmem>>, vector<1x1x1xf32>
    %33 = vector.shape_cast %16 : vector<8x1xf32> to vector<1x8x1xf32>
    %cst_20 = arith.constant dense<0.000000e+00> : vector<1xf32>
    %34 = vector.multi_reduction <add>, %33, %cst_20 [1, 2] : vector<1x8x1xf32> to vector<1xf32>
    %35 = vector.shape_cast %34 : vector<1xf32> to vector<1x1x1xf32>
    %36 = vector.extract %35[0, 0, 0] : f32 from vector<1x1x1xf32>
    %37 = vector.broadcast %36 : f32 to vector<1x1xf32>
    %38 = vector.shape_cast %37 : vector<1x1xf32> to vector<1x1x1xf32>
    %39 = arith.addf %32, %38 : vector<1x1x1xf32>
    %c0_21 = arith.constant 0 : index
    %c0_22 = arith.constant 0 : index
    %c0_23 = arith.constant 0 : index
    %40 = vector.load %arg7[%c0_21, %c0_22, %c0_23] : memref<1x1x1xf32, #tpu.memory_space<vmem>>, vector<1x1x1xf32>
    tpu.vector_store %arg7[%c0_21, %c0_22, %c0_23], %39 {strides = array<i32>} : memref<1x1x1xf32, #tpu.memory_space<vmem>>, vector<1x1x1xf32>,
    return
  }
  func.func @transform_0(%arg0: i32, %arg1: i32) -> (i32, i32) {
    %c1_i32 = arith.constant 1 : i32
    %0 = arith.muli %arg0, %c1_i32 : i32
    %1 = arith.addi %0, %arg1 : i32
    %c0_i32 = arith.constant 0 : i32
    %c0_i32_0 = arith.constant 0 : i32
    return %1, %c0_i32 : i32, i32
  }
  func.func @transform_1(%arg0: i32, %arg1: i32) -> (i32, i32) {
    %c1_i32 = arith.constant 1 : i32
    %0 = arith.muli %arg0, %c1_i32 : i32
    %1 = arith.addi %0, %arg1 : i32
    %c0_i32 = arith.constant 0 : i32
    %c0_i32_0 = arith.constant 0 : i32
    return %1, %c0_i32 : i32, i32
  }
  func.func @transform_2(%arg0: i32, %arg1: i32) -> (i32, i32) {
    %c0_i32 = arith.constant 0 : i32
    %c0_i32_0 = arith.constant 0 : i32
    %c0_i32_1 = arith.constant 0 : i32
    return %c0_i32, %c0_i32_0 : i32, i32
  }
  func.func @transform_3(%arg0: i32, %arg1: i32) -> (i32, i32) {
    %c0_i32 = arith.constant 0 : i32
    %c0_i32_0 = arith.constant 0 : i32
    %c0_i32_1 = arith.constant 0 : i32
    return %c0_i32, %c0_i32_0 : i32, i32
  }
  func.func @transform_4(%arg0: i32, %arg1: i32) -> (i32, i32, i32) {
    %c0_i32 = arith.constant 0 : i32
    %c0_i32_0 = arith.constant 0 : i32
    %c0_i32_1 = arith.constant 0 : i32
    return %arg0, %c0_i32, %c0_i32_0 : i32, i32, i32
  }
  func.func @transform_5(%arg0: i32, %arg1: i32) -> (i32, i32, i32) {
    %c0_i32 = arith.constant 0 : i32
    %c0_i32_0 = arith.constant 0 : i32
    %c0_i32_1 = arith.constant 0 : i32
    return %arg0, %c0_i32, %c0_i32_0 : i32, i32, i32
  }
}

</mosaic_0001>

<bundles_post_ra>
// kernel: tpu_custom_call.1
= control target key start
LH: loop header
LB: loop body
LE: loop exit
PB: predicated region body
PF: predicated region fallthrough
CT: control target
= control target key end

     0   :  { %11 = vsyncpa [#allocation3], 0  ;;  %s750_s18 = smov 0   ;;  %s752_s19 = smov 0   ;;  %s851_s0 = inlined_call_operand.vmem [shape: f32[16,128], index: 0, kind: input, shape index: {}]   ;;  %s852_s1 = inlined_call_operand.vmem [shape: s32[16,1], index: 1, kind: input, shape index: {}]   ;;  %s853_s2 = inlined_call_operand.hbm [shape: f32[128,128], index: 2, kind: input, shape index: {}]   ;;  %s854_s3 = inlined_call_operand.vmem [shape: f32[1,128], index: 3, kind: input, shape index: {}]   ;;  %s855_s4 = inlined_call_operand.vmem [shape: f32[2,1,1], index: 4, kind: output, shape index: {0}]   ;;  %s856_s5 = inlined_call_operand.vmem [shape: f32[2,1,1], index: 5, kind: output, shape index: {1}]  }
   0x1   :  { %s754_s20 = smov 0  }
   0x2 LB: > { %s545_s21 = sadd.s32 4294967295, %s711_s20   ;;  %s29_s22 = sadd.s32 1, %s707_s19  ;;  %s711_s20 = sphi %s754_s20, %s17_s20   ;;  %s707_s19 = sphi %s752_s19, %s860_s19   ;;  %s703_s18 = sphi %s750_s18, %s859_s18  }
   0x3   : > { %p31_p0 = scmp.ge.s32.totalorder %s29_s22, 2  ;;  %p547_p1 = scmp.ge.s32.totalorder %s711_s20, 1 }
   0x4   : > { %p184_p2 = scmp.lt.s32.totalorder %s711_s20, 3  ;;  %p775_p4 = scmp.eq.s32.totalorder %s545_s21, 0 }
   0x5   : > { %s862_s22 = smov (%p31_p0, %s29_s22), 0  ;;  %s713_s25 = smov [#allocation2]  }
   0x6   : > { %p771_p3 = pnand %p547_p1, %p184_p2  ;;  %s196_s26 = sshll.u32 %s713_s25, 4  ;;  %s197_s26 = int_to_ptr.vmem [resolvable:$true] %s196_s26 }
   0x7   : > { %s670_s27 = scalar_lea.vmem %s197_s26, 2048  ;;  %p678_p11 = scmp.lt.s32.totalorder %s197_s26, %s197_s26 }
   0x8   : > { %p619_p5 = pneg %p771_p3  ;;  %p671_p8 = scmp.ne.s32.totalorder %s197_s26, %s670_s27 }
   0x9   : > { %p679_p12 = scmp.lt.s32.totalorder %s670_s27, %s670_s27 }
   0xa   : > { %p620_p6 = pnand %p775_p4, %p619_p5 }
   0xb   : > { %p680_p13 = por %p679_p12, %p678_p11 }
   0xc   : > { %p661_p7 = pneg %p620_p6 }
   0xe   : > { %p673_p9 = pnand %p671_p8, %p661_p7 }
  0x10   : > { %p674_p10 = pneg %p673_p9 }
  0x12   : > { %p681_p0 = pnand %p680_p13, %p674_p10 }
  0x14   : > { %684 = shalt.err (!%p681_p0)
}
  0x15   : > { %s714_s28 = smov 128   ;;  %s715_s29 = smov 8  }
  0x16   : > { %622 = dma.hbm_to_vmem [thread:$0]  (!%p620_p6), %s853_s2, 2048, %s197_s26, [#allocation3], %s714_s28, %s714_s28, %s715_s29  }
  0x17   : > { %233 = sbr.rel (%p771_p3) target bundleno = 724 (0x2d4), region = 36 }
  0x1c   : > { %698 = dma.done.wait (%p775_p4), [#allocation3], 2048  }
  0x1d   : > { %700 = vsyncadd (%p775_p4), [#allocation3], 4294965248  ;;  %p268_p1 = scmp.lt.s32.totalorder %s703_s18, 1  ;;  %v716_v0 = vmov 0   ;;  %v717_v1 = vmov 0.0   ;;  %vm718_vm0 = vmmov 0   ;;  %v311_v19 = vlaneseq }
  0x1e   : > { %656 = vset.pattern.permute.xlu0 %v716_v0  ;;  %576 = vmatprep.subr.mxu0 %v717_v1  ;;  %v309_v3 = vld [vmem:[#allocation2 + $0x78] sm:$0xff]  ;;  %v308_v4 = vld [vmem:[#allocation2 + $0x70] sm:$0xff]  ;;  %v307_v5 = vld [vmem:[#allocation2 + $0x68] sm:$0xff]  ;;  %v719_v23 = vmov 1.0   ;;  %vm411_vm4 = vcmask 7168   ;;  %vm289_vm5 = vcmask 0  }
  0x1f   : > { %s864_s18 = smov (!%p268_p1, %s703_s18), 1  ;;  %608 = vmatprep.mubr.msk.f32.mxu0 %vm718_vm0, %v717_v1  ;;  %577 = vmatpush3.msra.mxu0 %v309_v3  ;;  %v306_v6 = vld [vmem:[#allocation2 + $0x60] sm:$0xff]  ;;  %v305_v7 = vld [vmem:[#allocation2 + $0x58] sm:$0xff]  ;;  %v304_v8 = vld [vmem:[#allocation2 + $0x50] sm:$0xff]  ;;  %v312_v20 = vand.u32 127, %v311_v19 }
  0x20   : > { %s552_s7 = sshll.u32 %s864_s18, 3  ;;  %578 = vmatprep.subr.mxu0 %v717_v1  ;;  %v303_v9 = vld [vmem:[#allocation2 + $0x48] sm:$0xff]  ;;  %v302_v10 = vld [vmem:[#allocation2 + $0x40] sm:$0xff]  ;;  %v301_v11 = vld [vmem:[#allocation2 + $0x38] sm:$0xff]  ;;  %s281_s21 = scalar_lea.vmem %s855_s4, %s864_s18 }
  0x21   : > { %s277_s10 = scalar_lea.vmem %s852_s1, %s552_s7  ;;  %579 = vmatpush3.msra.mxu0 %v308_v4  ;;  %v300_v12 = vld [vmem:[#allocation2 + $0x30] sm:$0xff]  ;;  %v299_v13 = vld [vmem:[#allocation2 + $0x28] sm:$0xff]  ;;  %v298_v14 = vld [vmem:[#allocation2 + $0x20] sm:$0xff]  ;;  %s271_s15 = scalar_lea.vmem %s851_s0, %s552_s7  ;;  %290 = vst.msk [vmem:[%s281_s21] sm:$0x1] %vm289_vm5, %v717_v1 }
  0x22   : > { %v293_v2 = vld [vmem:[%s277_s10] sm:$0xff]  ;;  %580 = vmatprep.subr.mxu0 %v717_v1  ;;  %v297_v15 = vld [vmem:[#allocation2 + $0x18] sm:$0xff]  ;;  %v296_v16 = vld [vmem:[#allocation2 + $0x10] sm:$0xff]  ;;  %s284_s25 = scalar_lea.vmem %s856_s5, %s864_s18 }
  0x23   : > { %314 = vperm.xlu0 %656, %v293_v2   ;;  %581 = vmatpush3.msra.mxu0 %v307_v5  ;;  %v295_v17 = vld [vmem:[#allocation2 + $0x8] sm:$0xff]  ;;  %v294_v18 = vld [vmem:[#allocation2] sm:$0xff]  ;;  %291 = vst.msk [vmem:[%s284_s25] sm:$0x1] %vm289_vm5, %v717_v1 }
  0x24   : > { %582 = vmatprep.subr.mxu0 %v717_v1  ;;  %v556_v22 = vld [vmem:[%s854_s3] ss:$0 sm:$0xff] }
  0x25   : > { %583 = vmatpush3.msra.mxu0 %v306_v6  ;;  %v292_v26 = vld [vmem:[%s271_s15] sm:$0xff] }
  0x26   : > { %584 = vmatprep.subr.mxu0 %v717_v1 }
  0x27   : > { %585 = vmatpush3.msra.mxu0 %v305_v7 }
  0x28   : > { %586 = vmatprep.subr.mxu0 %v717_v1  ;;  %v409_v55 = vld [vmem:[%s281_s21] sm:$0x1] }
  0x29   : > { %587 = vmatpush3.msra.mxu0 %v304_v8 }
  0x2a   : > { %588 = vmatprep.subr.mxu0 %v717_v1  ;;  %v426_v58 = vld [vmem:[%s284_s25] sm:$0x1] }
  0x2b   : > { %589 = vmatpush3.msra.mxu0 %v303_v9 }
  0x2c   : > { %590 = vmatprep.subr.mxu0 %v717_v1 }
  0x2d   : > { %591 = vmatpush3.msra.mxu0 %v302_v10 }
  0x2e   : > { %592 = vmatprep.subr.mxu0 %v717_v1 }
  0x2f   : > { %593 = vmatpush3.msra.mxu0 %v301_v11 }
  0x30   : > { %594 = vmatprep.subr.mxu0 %v717_v1 }
  0x31   : > { %595 = vmatpush3.msra.mxu0 %v300_v12 }
  0x32   : > { %596 = vmatprep.subr.mxu0 %v717_v1 }
  0x33   : > { %597 = vmatpush3.msra.mxu0 %v299_v13 }
  0x34   : > { %598 = vmatprep.subr.mxu0 %v717_v1 }
  0x35   : > { %599 = vmatpush3.msra.mxu0 %v298_v14 }
  0x36   : > { %600 = vmatprep.subr.mxu0 %v717_v1 }
  0x37   : > { %601 = vmatpush3.msra.mxu0 %v297_v15 }
  0x38   : > { %602 = vmatprep.subr.mxu0 %v717_v1 }
  0x39   : > { %603 = vmatpush3.msra.mxu0 %v296_v16 }
  0x3a   : > { %604 = vmatprep.subr.mxu0 %v717_v1 }
  0x3b   : > { %605 = vmatpush3.msra.mxu0 %v295_v17 }
  0x3c   : > { %606 = vmatprep.subr.mxu0 %v717_v1 }
  0x3d   : > { %607 = vmatpush3.msra.mxu0 %v294_v18 }
  0x9e   : > { %v315_v21 = vpop.permute.xlu0 %314 }
  0x9f   : > { %vm316_vm1 = vcmp.eq.s32.totalorder %v315_v21, %v312_v20 }
  0xa0   : > { %609 = vmatmul.mubr.msk.f32.vlgmr.msra.gmra.mxu0 %vm316_vm1, %v719_v23  ;;  %v554_v24 = vsel %vm316_vm1, 1.0, %v717_v1 }
  0xa1   : > { %v395_v25 = vmul.f32 %v556_v22, %v554_v24 }
  0xa3   : > { %396 = vadd.xlane.f32.xlu1 %v395_v25 }
 0x12c   : > { %v397_v36 = vpop.xlane.xlu1 %396 }
 0x12d   : > { %v427_v40 = vsel %vm411_vm4, %v397_v36, 0.0 }
 0x160   : > { %v385_v27 = vpop.f32.mrf.mxu0 }
 0x161   : > { %v398_v28 = vsub.f32 %v385_v27, %v292_v26 }
 0x162   : > { %v610_v29 = vpop.f32.mrf.mxu0 }
 0x163   : > { %v399_v30 = vmul.f32 %v398_v28, %v398_v28 }
 0x165   : > { %400 = vadd.xlane.f32.xlu0 %v399_v30 }
 0x1ee   : > { %v401_v31 = vpop.xlane.xlu0 %400 }
 0x1ef   : > { %657 = vrsqrt.f32 %v401_v31  ;;  %vm404_vm2 = vcmp.eq.f32.partialorder %v401_v31, inf  ;;  %v407_v34 = vand.u32 2147483648, %v401_v31  ;;  %vm406_vm3 = vcmp.eq.f32.partialorder %v401_v31, 0.0 }
 0x1fc   : > { %v658_v32 = vpop.eup %657 }
 0x1fd   : > { %v403_v33 = vmul.f32 %v658_v32, %v401_v31 }
 0x1ff   : > { %v405_v35 = vsel %vm404_vm2, %v401_v31, %v403_v33 }
 0x200   : > { %v408_v37 = vsel %vm406_vm3, %v407_v34, %v405_v35 }
 0x201   : > { %v410_v38 = vmul.f32 %v408_v37, %v397_v36 }
 0x203   : > { %v412_v39 = vsel %vm411_vm4, %v410_v38, 0.0 }
 0x204   : > { %413 = vadd.xlane.f32.xlu1 %v412_v39 }
 0x208   : > { %428 = vadd.xlane.f32.xlu1 %v427_v40 }
 0x28d   : > { %v414_v41 = vpop.xlane.xlu1 %413 }
 0x28e   : > { %v415_v42 = vrot.slane %v414_v41, 4 }
 0x290   : > { %v416_v43 = vadd.f32 %v415_v42, %v414_v41 }
 0x291   : > { %v429_v44 = vpop.xlane.xlu1 %428 }
 0x292   : > { %v417_v45 = vrot.slane %v416_v43, 2  ;;  %v430_v46 = vrot.slane %v429_v44, 4 }
 0x294   : > { %v431_v47 = vadd.f32 %v430_v46, %v429_v44  ;;  %v418_v48 = vadd.f32 %v417_v45, %v416_v43 }
 0x296   : > { %v432_v49 = vrot.slane %v431_v47, 2  ;;  %v419_v50 = vrot.slane %v418_v48, 1 }
 0x298   : > { %v433_v51 = vadd.f32 %v432_v49, %v431_v47  ;;  %v420_v52 = vadd.f32 %v419_v50, %v418_v48 }
 0x29a   : > { %611 = vpush %v420_v52  ;;  %v434_v53 = vrot.slane %v433_v51, 1 }
 0x29c   : > { %v435_v54 = vadd.f32 %v434_v53, %v433_v51 }
 0x29e   : > { %613 = vpush %v435_v54 }
 0x2cb   : > { %s612_s18 = spop %611 }
 0x2cc   : > { %v422_v56 = vstv %s612_s18 }
 0x2cd   : > { %v423_v57 = vadd.f32 %v422_v56, %v409_v55 }
 0x2cf   : > { %425 = vst.msk [vmem:[%s281_s21] sm:$0x1] %vm289_vm5, %v423_v57  ;;  %s614_s26 = spop %613 }
 0x2d0   : > { %v437_v59 = vstv %s614_s26 }
 0x2d1   : > { %v438_v60 = vadd.f32 %v437_v59, %v426_v58 }
 0x2d3   : > { %439 = vst.msk [vmem:[%s284_s25] sm:$0x1] %vm289_vm5, %v438_v60 }
 0x2d4 PF: > { %s17_s20 = sadd.s32 1, %s711_s20   ;;  %s859_s18 = smov %s707_s19 }
 0x2d5   : > { %p14_p2 = scmp.ge.s32.totalorder %s17_s20, 4   ;;  %s860_s19 = smov %s862_s22 }
 0x2d7   :  { %16 = sbr.rel (!%p14_p2) target bundleno = 2 (0x2), region = 90 }
 0x2dc   :  { %469 = vsyncpa [#allocation3], 1 }
 0x2dd   :  { %471 = vsyncpa [#allocation3 + $0x1], 1 }

</bundles_post_ra>
